<compile_context>
chip_gen: v5e
topology: v5e:2x2
jax: 0.10.0
libtpu: 0.0.40
codegen_flags: <defaults>
</compile_context>

<pallas_src>
import functools

import jax
import jax.numpy as jnp
from jax.experimental import pallas as pl
from jax.experimental.pallas import tpu as pltpu

MAX_TB = 2048   # max batch-tile rows (amortizes per-grid-step overhead)


def _round_up(n: int, m: int) -> int:
    return ((n + m - 1) // m) * m


def _choose_tile(batch: int):
    """Pick (tile_rows, padded_batch).

    Keeps >= 2 grid steps whenever the batch is big enough so the "parallel"
    grid axis can shard across v7x's two TensorCores (harmless on v5e/v6e),
    while capping the tile at MAX_TB rows.
    """
    b16 = _round_up(max(batch, 1), 16)          # sublane-friendly for f32 & bf16
    if b16 <= 512:                              # too small to usefully split
        return b16, b16
    tb = min(MAX_TB, _round_up(pl.cdiv(b16, 2), 16))
    return tb, _round_up(batch, tb)


def _ws_disc_kernel(x_ref, p_ref, wpf_ref, bpc_ref, w1x_ref, w1pe_ref, b1_ref,
                    w2_ref, b2_ref, w4_ref, b4_ref, o_ref, *, c_pad):
    f32 = jnp.float32
    x = x_ref[...]                                   # (TB, in_dim)
    p = p_ref[...]                                   # (TB, P)

    # One fused GEMM: params @ [Wpc | W1_params_rows]  -> (TB, C_pad + H_pad).
    # N = 256 fills the 256-wide v6e/v7x MXU in a single pass (two 128-wide
    # passes otherwise); f32 accumulation regardless of operand dtype.
    t = jnp.dot(p, wpf_ref[...], preferred_element_type=f32)

    # PsiCompressor: tanh(Linear(params[:, :psi_dim])).  Zero-padded rows/cols
    # contribute nothing (tanh(0)=0 feeds zero rows of W1_pe).
    pe = jnp.tanh(t[:, :c_pad] + bpc_ref[...])

    # fc1 + tanh.  torch.cat folded into row-split weights:
    #   cat([x, pe, params_rest]) @ W1
    #     == x @ W1_x + pe @ W1_pe + params_rest @ W1_rest
    a1 = (jnp.dot(x, w1x_ref[...], preferred_element_type=f32)
          + jnp.dot(pe.astype(w1pe_ref.dtype), w1pe_ref[...],
                    preferred_element_type=f32)
          + t[:, c_pad:] + b1_ref[...])
    h1 = jnp.tanh(a1)

    # fc2 + leaky_relu (PyTorch default negative_slope = 0.01), epilogue f32.
    a2 = jnp.dot(h1.astype(w2_ref.dtype), w2_ref[...],
                 preferred_element_type=f32) + b2_ref[...]
    h2 = jnp.where(a2 >= 0, a2, 0.01 * a2)

    # fc4: 1-wide score via VPU multiply + lane reduction (rides the otherwise
    # idle XLU slot); avoids a 127/128-zero MXU pass and a 128-wide f32 output
    # slab.  fc3 is intentionally absent: forward() never calls it.
    s = jnp.sum(h2 * w4_ref[...], axis=-1, keepdims=True) + b4_ref[...]
    o_ref[...] = s.astype(o_ref.dtype)


def pack_ws_discriminator_params(pc_w, pc_b, w1, b1, w2, b2, w4, b4, *,
                                 in_dim, psi_dim, compute_dtype=jnp.float32):
    """Pad / split / fuse the weights ONCE (hoisted out of the forward path).

    Layouts are (in, out) — i.e. the transpose of PyTorch's nn.Linear.weight.
    `w4`/`b4` must come from fc4 (fc3 is unused by forward() and not accepted
    here, so weight-loading code cannot silently slot it in).
    compute_dtype: MXU operand dtype (f32 or bf16 — bf16 is fine on v5e/v6e/
    v7x MXUs); accumulation and the elementwise epilogue are always f32.
    """
    f32 = jnp.float32
    in_dim, psi_dim = int(in_dim), int(psi_dim)
    pc_out = int(pc_w.shape[1])
    hidden = int(w1.shape[1])
    X_dim = int(w1.shape[0]) - in_dim - pc_out
    assert X_dim >= 0 and w2.shape == (hidden, hidden) and w4.shape == (hidden, 1)
    P = psi_dim + X_dim
    C_pad = _round_up(pc_out, 128)
    H_pad = _round_up(hidden, 128)
    cd = jnp.dtype(compute_dtype)

    # PsiCompressor weight lifted onto the full `params` columns (zero rows for
    # params[:, psi_dim:]) and column-fused with the params_rest rows of fc1.
    w_pcfc1 = jnp.zeros((P, C_pad + H_pad), f32)
    w_pcfc1 = w_pcfc1.at[:psi_dim, :pc_out].set(pc_w.astype(f32))
    w_pcfc1 = w_pcfc1.at[psi_dim:, C_pad:C_pad + hidden].set(
        w1[in_dim + pc_out:].astype(f32))

    w1x = jnp.zeros((in_dim, H_pad), f32).at[:, :hidden].set(
        w1[:in_dim].astype(f32))
    w1pe = jnp.zeros((C_pad, H_pad), f32).at[:pc_out, :hidden].set(
        w1[in_dim:in_dim + pc_out].astype(f32))
    w2p = jnp.zeros((H_pad, H_pad), f32).at[:hidden, :hidden].set(w2.astype(f32))
    w4r = jnp.zeros((1, H_pad), f32).at[0, :hidden].set(
        jnp.reshape(w4.astype(f32), (hidden,)))

    bpc = jnp.zeros((1, C_pad), f32).at[0, :pc_out].set(pc_b.astype(f32))
    b1p = jnp.zeros((1, H_pad), f32).at[0, :hidden].set(b1.astype(f32))
    b2p = jnp.zeros((1, H_pad), f32).at[0, :hidden].set(b2.astype(f32))
    b4p = jnp.reshape(b4.astype(f32), (1, 1))

    # MXU operands in compute_dtype; biases, w4 row (VPU) and epilogue stay f32.
    w_pcfc1, w1x, w1pe, w2p = (a.astype(cd) for a in (w_pcfc1, w1x, w1pe, w2p))

    weights = (w_pcfc1, bpc, w1x, w1pe, b1p, w2p, b2p, w4r, b4p)
    dims = dict(in_dim=in_dim, P=P, C_pad=C_pad, H_pad=H_pad)
    return weights, dims, cd


def ws_discriminator_fwd(x, params, packed):
    """Fused forward. x: (B, in_dim), params: (B, psi_dim + X_dim) -> (B, 1)."""
    weights, dims, cd = packed
    in_dim, P = dims["in_dim"], dims["P"]
    C_pad, H_pad = dims["C_pad"], dims["H_pad"]
    B = x.shape[0]
    assert x.shape[1] == in_dim and params.shape == (B, P)

    TB, B_pad = _choose_tile(B)
    if B_pad != B:
        x = jnp.pad(x, ((0, B_pad - B), (0, 0)))
        params = jnp.pad(params, ((0, B_pad - B), (0, 0)))
    x = x.astype(cd)
    params = params.astype(cd)

    itm = jnp.dtype(cd).itemsize
    wbytes = sum(int(w.size) * w.dtype.itemsize for w in weights)
    cost = pl.CostEstimate(
        flops=2 * B_pad * (P * (C_pad + H_pad) + in_dim * H_pad
                           + C_pad * H_pad + H_pad * H_pad + H_pad),
        transcendentals=B_pad * (C_pad + H_pad),
        bytes_accessed=B_pad * (in_dim + P) * itm + wbytes + B_pad * 4)

    cst = lambda i: (0, 0)   # weights stay VMEM-resident across grid steps
    row = lambda i: (i, 0)
    out = pl.pallas_call(
        functools.partial(_ws_disc_kernel, c_pad=C_pad),
        out_shape=jax.ShapeDtypeStruct((B_pad, 1), jnp.float32),
        grid=(B_pad // TB,),
        in_specs=[
            pl.BlockSpec((TB, in_dim), row),          # x batch tile
            pl.BlockSpec((TB, P), row),               # params batch tile
            pl.BlockSpec((P, C_pad + H_pad), cst),    # [Wpc | W1_params_rows]
            pl.BlockSpec((1, C_pad), cst),            # PsiCompressor bias
            pl.BlockSpec((in_dim, H_pad), cst),       # W1 rows acting on x
            pl.BlockSpec((C_pad, H_pad), cst),        # W1 rows acting on psi_emb
            pl.BlockSpec((1, H_pad), cst),            # b1
            pl.BlockSpec((H_pad, H_pad), cst),        # W2
            pl.BlockSpec((1, H_pad), cst),            # b2
            pl.BlockSpec((1, H_pad), cst),            # w4 as a row vector
            pl.BlockSpec((1, 1), cst),                # b4
        ],
        out_specs=pl.BlockSpec((TB, 1), row),
        compiler_params=pltpu.CompilerParams(
            # Independent batch tiles -> shard over v7x's two TensorCores.
            dimension_semantics=("parallel",),
            # Explicit limit: safe for v5e's 16 MiB default and <= v7x physical.
            vmem_limit_bytes=48 * 1024 * 1024),
        cost_estimate=cost,
    )(x, params, *weights)
    return out[:B]


def _ref_forward(x, params, pc_w, pc_b, w1, b1, w2, b2, w4, b4, psi_dim,
                 compute_dtype=jnp.float32):
    """Plain-JAX reference mirroring the PyTorch forward (and the kernel's
    operand-dtype / f32-accumulation convention)."""
    f32 = jnp.float32

    def dot(a, b):
        return jnp.dot(a.astype(compute_dtype), b.astype(compute_dtype),
                       preferred_element_type=f32,
                       precision=jax.lax.Precision.HIGHEST)

    pe = jnp.tanh(dot(params[:, :psi_dim], pc_w) + pc_b)
    cat = jnp.concatenate(
        [x.astype(f32), pe, params[:, psi_dim:].astype(f32)], axis=1)
    h1 = jnp.tanh(dot(cat, w1) + b1)
    a2 = dot(h1, w2) + b2
    h2 = jnp.where(a2 >= 0, a2, 0.01 * a2)
    return dot(h2, w4) + b4


if __name__ == "__main__":
    # Small shapes consistent with the module: in_dim=16, X_dim=1, psi_dim=2,
    # PsiCompressor out_dim=8, hidden_dim=32, batch=8.
    B, in_dim, X_dim, psi_dim = 8, 16, 1, 2
    pc_out_dim, hidden_dim = 8, 32

    keys = jax.random.split(jax.random.PRNGKey(0), 9)

    def xavier(k, fan_in, fan_out):
        std = (2.0 / (fan_in + fan_out)) ** 0.5
        return std * jax.random.normal(k, (fan_in, fan_out), jnp.float32)

    # PsiCompressor assumed to be Linear(psi_dim, out_dim) + tanh, stored in
    # (in, out) layout (PyTorch weight transposed).
    bound = 1.0 / (psi_dim ** 0.5)
    pc_w = jax.random.uniform(keys[0], (psi_dim, pc_out_dim), jnp.float32,
                              -bound, bound)
    pc_b = jax.random.uniform(keys[1], (pc_out_dim,), jnp.float32, -bound, bound)

    cat_dim = in_dim + pc_out_dim + X_dim
    w1 = xavier(keys[2], cat_dim, hidden_dim)
    b1 = jnp.zeros((hidden_dim,), jnp.float32)
    w2 = xavier(keys[3], hidden_dim, hidden_dim)
    b2 = jnp.zeros((hidden_dim,), jnp.float32)
    w4 = xavier(keys[4], hidden_dim, 1)          # fc4 (fc3 is unused by forward)
    b4 = jnp.zeros((1,), jnp.float32)

    x = jax.random.normal(keys[5], (B, in_dim), jnp.float32)
    params = jax.random.normal(keys[6], (B, psi_dim + X_dim), jnp.float32)

    # ---- pack weights once (hoisted out of the per-call path) --------------
    packed = pack_ws_discriminator_params(
        pc_w, pc_b, w1, b1, w2, b2, w4, b4, in_dim=in_dim, psi_dim=psi_dim)
    fwd = jax.jit(lambda xx, pp: ws_discriminator_fwd(xx, pp, packed))

    # ---- f32 path, single batch tile ---------------------------------------
    out = jax.block_until_ready(fwd(x, params))
    ref = _ref_forward(x, params, pc_w, pc_b, w1, b1, w2, b2, w4, b4, psi_dim)
    assert out.shape == (B, 1)
    assert jnp.allclose(out, ref, atol=2e-3, rtol=2e-3)

    # ---- larger batch: >=2-step "parallel" grid (v7x megacore) + row padding
    B2 = 1000
    x2 = jax.random.normal(keys[7], (B2, in_dim), jnp.float32)
    params2 = jax.random.normal(keys[8], (B2, psi_dim + X_dim), jnp.float32)
    out2 = jax.block_until_ready(fwd(x2, params2))
    ref2 = _ref_forward(x2, params2, pc_w, pc_b, w1, b1, w2, b2, w4, b4, psi_dim)
    assert out2.shape == (B2, 1)
    assert jnp.allclose(out2, ref2, atol=2e-3, rtol=2e-3)

    # ---- bf16 MXU-operand path (works on v5e/v6e/v7x), f32 accum/epilogue --
    packed_bf16 = pack_ws_discriminator_params(
        pc_w, pc_b, w1, b1, w2, b2, w4, b4, in_dim=in_dim, psi_dim=psi_dim,
        compute_dtype=jnp.bfloat16)
    fwd_bf16 = jax.jit(lambda xx, pp: ws_discriminator_fwd(xx, pp, packed_bf16))
    out_bf = jax.block_until_ready(fwd_bf16(x, params))
    ref_bf = _ref_forward(x, params, pc_w, pc_b, w1, b1, w2, b2, w4, b4, psi_dim,
                          compute_dtype=jnp.bfloat16)
    assert jnp.allclose(out_bf, ref_bf, atol=2e-2, rtol=2e-2)

    print("KERNEL_OK")
</pallas_src>

<mosaic_0001>
module attributes {stable_mosaic.version = 11 : i64} {
  func.func @_ws_disc_kernel(%arg0: i32, %arg1: memref<16x16xf32, #tpu.memory_space<vmem>>, %arg2: memref<16x3xf32, #tpu.memory_space<vmem>>, %arg3: memref<3x256xf32, #tpu.memory_space<vmem>>, %arg4: memref<1x128xf32, #tpu.memory_space<vmem>>, %arg5: memref<16x128xf32, #tpu.memory_space<vmem>>, %arg6: memref<128x128xf32, #tpu.memory_space<vmem>>, %arg7: memref<1x128xf32, #tpu.memory_space<vmem>>, %arg8: memref<128x128xf32, #tpu.memory_space<vmem>>, %arg9: memref<1x128xf32, #tpu.memory_space<vmem>>, %arg10: memref<1x128xf32, #tpu.memory_space<vmem>>, %arg11: memref<1x1xf32, #tpu.memory_space<vmem>>, %arg12: memref<16x1xf32, #tpu.memory_space<vmem>>) attributes {dimension_semantics = [#tpu.dimension_semantics<parallel>], iteration_bounds = array<i64: 1>, scalar_prefetch = 0 : i64, scratch_operands = 0 : i64, tpu.core_type = #tpu.core_type<tc>, window_params = [{transform_indices = @transform_0, window_bounds = array<i64: 16, 16>}, {transform_indices = @transform_1, window_bounds = array<i64: 16, 3>}, {pipeline_mode = #tpu.pipeline_mode<synchronous>, transform_indices = @transform_2, window_bounds = array<i64: 3, 256>}, {pipeline_mode = #tpu.pipeline_mode<synchronous>, transform_indices = @transform_3, window_bounds = array<i64: 1, 128>}, {pipeline_mode = #tpu.pipeline_mode<synchronous>, transform_indices = @transform_4, window_bounds = array<i64: 16, 128>}, {pipeline_mode = #tpu.pipeline_mode<synchronous>, transform_indices = @transform_5, window_bounds = array<i64: 128, 128>}, {pipeline_mode = #tpu.pipeline_mode<synchronous>, transform_indices = @transform_6, window_bounds = array<i64: 1, 128>}, {pipeline_mode = #tpu.pipeline_mode<synchronous>, transform_indices = @transform_7, window_bounds = array<i64: 128, 128>}, {pipeline_mode = #tpu.pipeline_mode<synchronous>, transform_indices = @transform_8, window_bounds = array<i64: 1, 128>}, {pipeline_mode = #tpu.pipeline_mode<synchronous>, transform_indices = @transform_9, window_bounds = array<i64: 1, 128>}, {pipeline_mode = #tpu.pipeline_mode<synchronous>, transform_indices = @transform_10, window_bounds = array<i64: 1, 1>}, {transform_indices = @transform_11, window_bounds = array<i64: 16, 1>}]} {
    %c0 = arith.constant 0 : index
    %c0_0 = arith.constant 0 : index
    %0 = vector.load %arg1[%c0, %c0_0] : memref<16x16xf32, #tpu.memory_space<vmem>>, vector<16x16xf32>
    %c0_1 = arith.constant 0 : index
    %c0_2 = arith.constant 0 : index
    %1 = vector.load %arg2[%c0_1, %c0_2] : memref<16x3xf32, #tpu.memory_space<vmem>>, vector<16x3xf32>
    %c0_3 = arith.constant 0 : index
    %c0_4 = arith.constant 0 : index
    %2 = vector.load %arg3[%c0_3, %c0_4] : memref<3x256xf32, #tpu.memory_space<vmem>>, vector<3x256xf32>
    %cst = arith.constant dense<0.000000e+00> : vector<16x256xf32>
    %3 = tpu.matmul %1, %2, %cst {dimension_numbers = #tpu.dot_dimension_numbers<[1], [0], [0], [1], [0, 0, 1, 1], [], []>} : vector<16x3xf32>, vector<3x256xf32>, vector<16x256xf32> -> vector<16x256xf32>
    %4 = vector.extract_strided_slice %3 {offsets = [0, 0], sizes = [16, 128], strides = [1, 1]} : vector<16x256xf32> to vector<16x128xf32>
    %c0_5 = arith.constant 0 : index
    %c0_6 = arith.constant 0 : index
    %5 = vector.load %arg4[%c0_5, %c0_6] : memref<1x128xf32, #tpu.memory_space<vmem>>, vector<1x128xf32>
    %6 = vector.broadcast %5 : vector<1x128xf32> to vector<16x128xf32>
    %7 = arith.addf %4, %6 : vector<16x128xf32>
    %8 = math.tanh %7 : vector<16x128xf32>
    %c0_7 = arith.constant 0 : index
    %c0_8 = arith.constant 0 : index
    %9 = vector.load %arg5[%c0_7, %c0_8] : memref<16x128xf32, #tpu.memory_space<vmem>>, vector<16x128xf32>
    %cst_9 = arith.constant dense<0.000000e+00> : vector<16x128xf32>
    %10 = tpu.matmul %0, %9, %cst_9 {dimension_numbers = #tpu.dot_dimension_numbers<[1], [0], [0], [1], [0, 0, 1, 1], [], []>} : vector<16x16xf32>, vector<16x128xf32>, vector<16x128xf32> -> vector<16x128xf32>
    %c0_10 = arith.constant 0 : index
    %c0_11 = arith.constant 0 : index
    %11 = vector.load %arg6[%c0_10, %c0_11] : memref<128x128xf32, #tpu.memory_space<vmem>>, vector<128x128xf32>
    %cst_12 = arith.constant dense<0.000000e+00> : vector<16x128xf32>
    %12 = tpu.matmul %8, %11, %cst_12 {dimension_numbers = #tpu.dot_dimension_numbers<[1], [0], [0], [1], [0, 0, 1, 1], [], []>} : vector<16x128xf32>, vector<128x128xf32>, vector<16x128xf32> -> vector<16x128xf32>
    %13 = arith.addf %10, %12 : vector<16x128xf32>
    %14 = vector.extract_strided_slice %3 {offsets = [0, 128], sizes = [16, 128], strides = [1, 1]} : vector<16x256xf32> to vector<16x128xf32>
    %15 = arith.addf %13, %14 : vector<16x128xf32>
    %c0_13 = arith.constant 0 : index
    %c0_14 = arith.constant 0 : index
    %16 = vector.load %arg7[%c0_13, %c0_14] : memref<1x128xf32, #tpu.memory_space<vmem>>, vector<1x128xf32>
    %17 = vector.broadcast %16 : vector<1x128xf32> to vector<16x128xf32>
    %18 = arith.addf %15, %17 : vector<16x128xf32>
    %19 = math.tanh %18 : vector<16x128xf32>
    %c0_15 = arith.constant 0 : index
    %c0_16 = arith.constant 0 : index
    %20 = vector.load %arg8[%c0_15, %c0_16] : memref<128x128xf32, #tpu.memory_space<vmem>>, vector<128x128xf32>
    %cst_17 = arith.constant dense<0.000000e+00> : vector<16x128xf32>
    %21 = tpu.matmul %19, %20, %cst_17 {dimension_numbers = #tpu.dot_dimension_numbers<[1], [0], [0], [1], [0, 0, 1, 1], [], []>} : vector<16x128xf32>, vector<128x128xf32>, vector<16x128xf32> -> vector<16x128xf32>
    %c0_18 = arith.constant 0 : index
    %c0_19 = arith.constant 0 : index
    %22 = vector.load %arg9[%c0_18, %c0_19] : memref<1x128xf32, #tpu.memory_space<vmem>>, vector<1x128xf32>
    %23 = vector.broadcast %22 : vector<1x128xf32> to vector<16x128xf32>
    %24 = arith.addf %21, %23 : vector<16x128xf32>
    %cst_20 = arith.constant 0.000000e+00 : f32
    %25 = vector.broadcast %cst_20 : f32 to vector<16x128xf32>
    %26 = arith.cmpf oge, %24, %25 : vector<16x128xf32>
    %cst_21 = arith.constant 0.00999999977 : f32
    %27 = vector.broadcast %cst_21 : f32 to vector<16x128xf32>
    %28 = arith.mulf %27, %24 : vector<16x128xf32>
    %29 = arith.select %26, %24, %28 : vector<16x128xi1>, vector<16x128xf32>
    %c0_22 = arith.constant 0 : index
    %c0_23 = arith.constant 0 : index
    %30 = vector.load %arg10[%c0_22, %c0_23] : memref<1x128xf32, #tpu.memory_space<vmem>>, vector<1x128xf32>
    %31 = vector.broadcast %30 : vector<1x128xf32> to vector<16x128xf32>
    %32 = arith.mulf %29, %31 : vector<16x128xf32>
    %cst_24 = arith.constant dense<0.000000e+00> : vector<16xf32>
    %33 = vector.multi_reduction <add>, %32, %cst_24 [1] : vector<16x128xf32> to vector<16xf32>
    %34 = vector.shape_cast %33 : vector<16xf32> to vector<16x1xf32>
    %c0_25 = arith.constant 0 : index
    %c0_26 = arith.constant 0 : index
    %35 = vector.load %arg11[%c0_25, %c0_26] : memref<1x1xf32, #tpu.memory_space<vmem>>, vector<1x1xf32>
    %36 = vector.broadcast %35 : vector<1x1xf32> to vector<16x1xf32>
    %37 = arith.addf %34, %36 : vector<16x1xf32>
    %c0_27 = arith.constant 0 : index
    %c0_28 = arith.constant 0 : index
    %38 = vector.load %arg12[%c0_27, %c0_28] : memref<16x1xf32, #tpu.memory_space<vmem>>, vector<16x1xf32>
    tpu.vector_store %arg12[%c0_27, %c0_28], %37 {strides = array<i32>} : memref<16x1xf32, #tpu.memory_space<vmem>>, vector<16x1xf32>,
    return
  }
  func.func @transform_0(%arg0: i32) -> (i32, i32) {
    %c0_i32 = arith.constant 0 : i32
    %c0_i32_0 = arith.constant 0 : i32
    return %arg0, %c0_i32 : i32, i32
  }
  func.func @transform_1(%arg0: i32) -> (i32, i32) {
    %c0_i32 = arith.constant 0 : i32
    %c0_i32_0 = arith.constant 0 : i32
    return %arg0, %c0_i32 : i32, i32
  }
  func.func @transform_2(%arg0: i32) -> (i32, i32) {
    %c0_i32 = arith.constant 0 : i32
    %c0_i32_0 = arith.constant 0 : i32
    %c0_i32_1 = arith.constant 0 : i32
    return %c0_i32, %c0_i32_0 : i32, i32
  }
  func.func @transform_3(%arg0: i32) -> (i32, i32) {
    %c0_i32 = arith.constant 0 : i32
    %c0_i32_0 = arith.constant 0 : i32
    %c0_i32_1 = arith.constant 0 : i32
    return %c0_i32, %c0_i32_0 : i32, i32
  }
  func.func @transform_4(%arg0: i32) -> (i32, i32) {
    %c0_i32 = arith.constant 0 : i32
    %c0_i32_0 = arith.constant 0 : i32
    %c0_i32_1 = arith.constant 0 : i32
    return %c0_i32, %c0_i32_0 : i32, i32
  }
  func.func @transform_5(%arg0: i32) -> (i32, i32) {
    %c0_i32 = arith.constant 0 : i32
    %c0_i32_0 = arith.constant 0 : i32
    %c0_i32_1 = arith.constant 0 : i32
    return %c0_i32, %c0_i32_0 : i32, i32
  }
  func.func @transform_6(%arg0: i32) -> (i32, i32) {
    %c0_i32 = arith.constant 0 : i32
    %c0_i32_0 = arith.constant 0 : i32
    %c0_i32_1 = arith.constant 0 : i32
    return %c0_i32, %c0_i32_0 : i32, i32
  }
  func.func @transform_7(%arg0: i32) -> (i32, i32) {
    %c0_i32 = arith.constant 0 : i32
    %c0_i32_0 = arith.constant 0 : i32
    %c0_i32_1 = arith.constant 0 : i32
    return %c0_i32, %c0_i32_0 : i32, i32
  }
  func.func @transform_8(%arg0: i32) -> (i32, i32) {
    %c0_i32 = arith.constant 0 : i32
    %c0_i32_0 = arith.constant 0 : i32
    %c0_i32_1 = arith.constant 0 : i32
    return %c0_i32, %c0_i32_0 : i32, i32
  }
  func.func @transform_9(%arg0: i32) -> (i32, i32) {
    %c0_i32 = arith.constant 0 : i32
    %c0_i32_0 = arith.constant 0 : i32
    %c0_i32_1 = arith.constant 0 : i32
    return %c0_i32, %c0_i32_0 : i32, i32
  }
  func.func @transform_10(%arg0: i32) -> (i32, i32) {
    %c0_i32 = arith.constant 0 : i32
    %c0_i32_0 = arith.constant 0 : i32
    %c0_i32_1 = arith.constant 0 : i32
    return %c0_i32, %c0_i32_0 : i32, i32
  }
  func.func @transform_11(%arg0: i32) -> (i32, i32) {
    %c0_i32 = arith.constant 0 : i32
    %c0_i32_0 = arith.constant 0 : i32
    return %arg0, %c0_i32 : i32, i32
  }
}

</mosaic_0001>

<bundles_post_ra>
// kernel: _lambda_.1
= control target key start
LH: loop header
LB: loop body
LE: loop exit
PB: predicated region body
PF: predicated region fallthrough
CT: control target
= control target key end

     0   :  { %s513_s0 = inlined_call_operand.vmem [shape: f32[16,16], index: 0, kind: input, shape index: {}]   ;;  %s514_s1 = inlined_call_operand.vmem [shape: f32[16,3], index: 1, kind: input, shape index: {}]   ;;  %s515_s2 = inlined_call_operand.vmem [shape: f32[3,256], index: 2, kind: input, shape index: {}]   ;;  %s516_s3 = inlined_call_operand.vmem [shape: f32[1,128], index: 3, kind: input, shape index: {}]   ;;  %s517_s4 = inlined_call_operand.vmem [shape: f32[16,128], index: 4, kind: input, shape index: {}]   ;;  %s518_s5 = inlined_call_operand.hbm [shape: f32[128,128], index: 5, kind: input, shape index: {}]   ;;  %s519_s6 = inlined_call_operand.vmem [shape: f32[1,128], index: 6, kind: input, shape index: {}, may-alias: {6,8}]   ;;  %s520_s7 = inlined_call_operand.hbm [shape: f32[128,128], index: 7, kind: input, shape index: {}]   ;;  %s521_s8 = inlined_call_operand.vmem [shape: f32[1,128], index: 8, kind: input, shape index: {}, may-alias: {6,8}]   ;;  %s522_s9 = inlined_call_operand.vmem [shape: f32[1,128], index: 9, kind: input, shape index: {}]   ;;  %s523_s10 = inlined_call_operand.<no memory space> [shape: f32[1,1], index: 10, kind: input, shape index: {}]   ;;  %s524_s11 = inlined_call_operand.vmem [shape: f32[16,1], index: 11, kind: output, shape index: {}]  }
   0x1   :  { %v16_v0 = vstv %s523_s10 }
   0x2   :  { %17 = vst [vmem:[#allocation2] sm:$0x1] %v16_v0 }
   0x3   :  { %18 = vsyncpa [#allocation4], 0  ;;  %s34_s21 = sshll.u32 %s518_s5, 4  ;;  %s35_s21 = int_to_ptr.hbm [resolvable:$true] %s34_s21 }
   0x4   :  { %19 = vsyncpa [#allocation6], 0  ;;  %s395_s22 = smov [#allocation3]   ;;  %s49_s26 = sshll.u32 %s520_s7, 4  ;;  %s50_s26 = int_to_ptr.hbm [resolvable:$true] %s49_s26 }
   0x5   :  { %s36_s23 = sshll.u32 %s395_s22, 4  ;;  %s396_s27 = smov 128   ;;  %s37_s23 = int_to_ptr.vmem [resolvable:$true] %s36_s23 }
   0x6   :  { %s397_s28 = smov 8   ;;  %s398_s10 = smov [#allocation5]  }
   0x7   :  { %42 = dma.hbm_to_vmem [thread:$0]  %s35_s21, 2048, %s37_s23, [#allocation4], %s396_s27, %s396_s27, %s397_s28  }
   0x8   :  { %s51_s29 = sshll.u32 %s398_s10, 4  ;;  %s52_s29 = int_to_ptr.vmem [resolvable:$true] %s51_s29 }
   0x9   :  { %57 = dma.hbm_to_vmem [thread:$0]  %s50_s26, 2048, %s52_s29, [#allocation6], %s396_s27, %s396_s27, %s397_s28  }
   0xa   :  { %391 = dma.done.wait [#allocation4], 2048  }
   0xb   :  { %392 = vsyncadd [#allocation4], 4294965248 }
   0xc   :  { %393 = dma.done.wait [#allocation6], 2048  }
   0xd   :  { %394 = vsyncadd [#allocation6], 4294965248  ;;  %v76_v1 = vld [vmem:[%s515_s2] sm:$0x77]  ;;  %v162_v4 = vld [vmem:[#allocation3 + $0x68] sm:$0xff]  ;;  %vm88_vm0 = vcmask 1042432  }
   0xe   :  { %78 = vst [vmem:[#allocation1] ss:$2 sm:$0xff] %v76_v1  ;;  %v164_v2 = vld [vmem:[#allocation3 + $0x78] sm:$0xff]  ;;  %v163_v3 = vld [vmem:[#allocation3 + $0x70] sm:$0xff]  ;;  %v161_v5 = vld [vmem:[#allocation3 + $0x60] sm:$0xff]  ;;  %vm81_vm1 = vcmask 23552  }
   0xf   :  { %165 = vmatpush.msra.mxu2 %v164_v2  ;;  %v74_v6 = vld [vmem:[%s514_s1] sm:$0xff]  ;;  %v158_v10 = vld [vmem:[#allocation3 + $0x48] sm:$0xff]  ;;  %v157_v11 = vld [vmem:[#allocation3 + $0x40] sm:$0xff]  ;;  %vm188_vm2 = vcmask 130048   ;;  %vm293_vm5 = vcmask 7168  }
  0x10   :  { %v160_v7 = vld [vmem:[#allocation3 + $0x58] sm:$0xff]  ;;  %v159_v9 = vld [vmem:[#allocation3 + $0x50] sm:$0xff]  ;;  %v154_v15 = vld [vmem:[#allocation3 + $0x28] sm:$0xff] }
  0x11   :  { %166 = vmatpush.msra.mxu2 %v163_v3  ;;  %v75_v12 = vld [vmem:[%s514_s1 + $0x8] sm:$0xff]  ;;  %v155_v14 = vld [vmem:[#allocation3 + $0x30] sm:$0xff]  ;;  %v150_v20 = vld [vmem:[#allocation3 + $0x8] sm:$0xff] }
  0x12   :  { %v156_v13 = vld [vmem:[#allocation3 + $0x38] sm:$0xff]  ;;  %v153_v16 = vld [vmem:[#allocation3 + $0x20] sm:$0xff]  ;;  %v151_v18 = vld [vmem:[#allocation3 + $0x10] sm:$0xff] }
  0x13   :  { %167 = vmatpush.msra.mxu2 %v162_v4  ;;  %v152_v17 = vld [vmem:[#allocation3 + $0x18] sm:$0xff]  ;;  %v149_v21 = vld [vmem:[#allocation3] sm:$0xff]  ;;  %v242_v27 = vld [vmem:[#allocation5 + $0x70] sm:$0xff] }
  0x14   :  { %v148_v19 = vld [vmem:[%s517_s4 + $0x8] sm:$0xff]  ;;  %v147_v22 = vld [vmem:[%s517_s4] sm:$0xff]  ;;  %v241_v28 = vld [vmem:[#allocation5 + $0x68] sm:$0xff] }
  0x15   :  { %v79_v8 = vld.sshfl [vmem:[#allocation1] sm:$0xff pattern:$0x75316420]  ;;  %168 = vmatpush.msra.mxu2 %v161_v5  ;;  %209 = vmatpush.msra.mxu3 %v148_v19  ;;  %v80_v24 = vld.sshfl [vmem:[#allocation1 + $0x8] sm:$0xff pattern:$0x75316420] }
  0x16   :  { %302 = vmatpush.msk.msra.mxu0 %vm88_vm0, %v79_v8  ;;  %v72_v23 = vld [vmem:[%s513_s0] sm:$0xff]  ;;  %305 = vmatpush.msk.msra.mxu1 %vm88_vm0, %v80_v24  ;;  %v73_v25 = vld [vmem:[%s513_s0 + $0x8] sm:$0xff]  ;;  %v237_v32 = vld [vmem:[#allocation5 + $0x48] sm:$0xff] }
  0x17   :  { %303 = vmatmul.msk.f32.vlgmr.msra.gmra.mxu0 %vm81_vm1, %v74_v6  ;;  %169 = vmatpush.msra.mxu2 %v160_v7  ;;  %v243_v26 = vld [vmem:[#allocation5 + $0x78] sm:$0xff]  ;;  %v240_v29 = vld [vmem:[#allocation5 + $0x60] sm:$0xff]  ;;  %v238_v31 = vld [vmem:[#allocation5 + $0x50] sm:$0xff] }
  0x18   :  { %210 = vmatpush.msra.mxu3 %v147_v22  ;;  %306 = vmatmul.msk.f32.vlgmr.msra.gmra.mxu1 %vm81_vm1, %v74_v6  ;;  %v239_v30 = vld [vmem:[#allocation5 + $0x58] sm:$0xff]  ;;  %v330_v33 = vld [vmem:[%s516_s3] ss:$0 sm:$0xff]  ;;  %v236_v34 = vld [vmem:[#allocation5 + $0x40] sm:$0xff] }
  0x19   :  { %170 = vmatpush.msra.mxu2 %v159_v9  ;;  %308 = vmatmul.msk.f32.vlgmr.msra.gmra.mxu3 %vm188_vm2, %v72_v23  ;;  %v235_v36 = vld [vmem:[#allocation5 + $0x38] sm:$0xff]  ;;  %v234_v42 = vld [vmem:[#allocation5 + $0x30] sm:$0xff]  ;;  %v233_v43 = vld [vmem:[#allocation5 + $0x28] sm:$0xff] }
  0x1a   :  { %248 = vmatpush.msrb.mxu0 %v243_v26  ;;  %310 = vmatpush.msrb.mxu1 %v243_v26  ;;  %v232_v44 = vld [vmem:[#allocation5 + $0x20] sm:$0xff]  ;;  %v231_v45 = vld [vmem:[#allocation5 + $0x18] sm:$0xff]  ;;  %v230_v46 = vld [vmem:[#allocation5 + $0x10] sm:$0xff] }
  0x1b   :  { %171 = vmatpush.msra.mxu2 %v158_v10  ;;  %v229_v47 = vld [vmem:[#allocation5 + $0x8] sm:$0xff]  ;;  %v228_v48 = vld [vmem:[#allocation5] sm:$0xff]  ;;  %v331_v53 = vld [vmem:[%s519_s6] ss:$0 sm:$0xff] }
  0x1c   :  { %249 = vmatpush.msrb.mxu0 %v242_v27  ;;  %311 = vmatpush.msrb.mxu1 %v242_v27  ;;  %v332_v0 = vld [vmem:[%s521_s8] ss:$0 sm:$0xff] }
  0x1d   :  { %172 = vmatpush.msra.mxu2 %v157_v11  ;;  %v333_v3 = vld [vmem:[%s522_s9] ss:$0 sm:$0xff] }
  0x1e   :  { %250 = vmatpush.msrb.mxu0 %v241_v28  ;;  %312 = vmatpush.msrb.mxu1 %v241_v28 }
  0x1f   :  { %304 = vmatmul.msk.f32.gmra.mxu0 %vm81_vm1, %v75_v12  ;;  %173 = vmatpush.msra.mxu2 %v156_v13 }
  0x20   :  { %307 = vmatmul.msk.f32.gmra.mxu1 %vm81_vm1, %v75_v12  ;;  %251 = vmatpush.msrb.mxu0 %v240_v29  ;;  %v334_v12 = vld [vmem:[#allocation2] ss:$0 sm:$0xff] }
  0x21   :  { %174 = vmatpush.msra.mxu2 %v155_v14  ;;  %309 = vmatmul.msk.f32.gmra.mxu3 %vm188_vm2, %v73_v25 }
  0x22   :  { %313 = vmatpush.msrb.mxu1 %v240_v29  ;;  %252 = vmatpush.msrb.mxu0 %v239_v30 }
  0x23   :  { %175 = vmatpush.msra.mxu2 %v154_v15 }
  0x24   :  { %314 = vmatpush.msrb.mxu1 %v239_v30  ;;  %253 = vmatpush.msrb.mxu0 %v238_v31 }
  0x25   :  { %176 = vmatpush.msra.mxu2 %v153_v16 }
  0x26   :  { %315 = vmatpush.msrb.mxu1 %v238_v31  ;;  %254 = vmatpush.msrb.mxu0 %v237_v32 }
  0x27   :  { %177 = vmatpush.msra.mxu2 %v152_v17 }
  0x28   :  { %316 = vmatpush.msrb.mxu1 %v237_v32  ;;  %255 = vmatpush.msrb.mxu0 %v236_v34 }
  0x29   :  { %178 = vmatpush.msra.mxu2 %v151_v18 }
  0x2a   :  { %317 = vmatpush.msrb.mxu1 %v236_v34  ;;  %256 = vmatpush.msrb.mxu0 %v235_v36 }
  0x2b   :  { %179 = vmatpush.msra.mxu2 %v150_v20 }
  0x2c   :  { %318 = vmatpush.msrb.mxu1 %v235_v36  ;;  %257 = vmatpush.msrb.mxu0 %v234_v42 }
  0x2d   :  { %180 = vmatpush.msra.mxu2 %v149_v21 }
  0x2e   :  { %319 = vmatpush.msrb.mxu1 %v234_v42  ;;  %258 = vmatpush.msrb.mxu0 %v233_v43 }
  0x30   :  { %320 = vmatpush.msrb.mxu1 %v233_v43  ;;  %259 = vmatpush.msrb.mxu0 %v232_v44 }
  0x32   :  { %321 = vmatpush.msrb.mxu1 %v232_v44  ;;  %260 = vmatpush.msrb.mxu0 %v231_v45 }
  0x34   :  { %322 = vmatpush.msrb.mxu1 %v231_v45  ;;  %261 = vmatpush.msrb.mxu0 %v230_v46 }
  0x36   :  { %323 = vmatpush.msrb.mxu1 %v230_v46  ;;  %262 = vmatpush.msrb.mxu0 %v229_v47 }
  0x38   :  { %324 = vmatpush.msrb.mxu1 %v229_v47  ;;  %263 = vmatpush.msrb.mxu0 %v228_v48 }
  0x3a   :  { %325 = vmatpush.msrb.mxu1 %v228_v48 }
  0x94   :  { %v110_v35 = vpop.f32.mrf.mxu0 }
  0x95   :  { %v143_v37 = vadd.f32 %v330_v33, %v110_v35  ;;  %v133_v50 = vpop.f32.mrf.mxu1 }
  0x97   :  { %335 = vtanh.f32 %v143_v37 }
  0x9c   :  { %v113_v38 = vpop.f32.mrf.mxu0  ;;  %v212_v49 = vpop.f32.mrf.mxu3 }
  0x9d   :  { %v336_v39 = vpop.eup %335  ;;  %v144_v40 = vadd.f32 %v330_v33, %v113_v38  ;;  %v136_v58 = vpop.f32.mrf.mxu1 }
  0x9e   :  { %181 = vmatmul.f32.vlgmr.msra.gmra.mxu2 %v336_v39 }
  0x9f   :  { %337 = vtanh.f32 %v144_v40 }
  0xa4   :  { %v215_v56 = vpop.f32.mrf.mxu3 }
  0xa5   :  { %v338_v41 = vpop.eup %337 }
  0xa6   :  { %184 = vmatmul.f32.gmra.mxu2 %v338_v41 }
 0x121   :  { %v182_v51 = vpop.f32.mrf.mxu2 }
 0x122   :  { %v213_v52 = vadd.f32 %v212_v49, %v182_v51 }
 0x124   :  { %v218_v54 = vadd.f32 %v213_v52, %v133_v50 }
 0x126   :  { %v224_v55 = vadd.f32 %v331_v53, %v218_v54 }
 0x128   :  { %339 = vtanh.f32 %v224_v55 }
 0x129   :  { %v185_v57 = vpop.f32.mrf.mxu2 }
 0x12a   :  { %v216_v59 = vadd.f32 %v215_v56, %v185_v57 }
 0x12c   :  { %v219_v60 = vadd.f32 %v216_v59, %v136_v58 }
 0x12e   :  { %v340_v61 = vpop.eup %339  ;;  %v225_v62 = vadd.f32 %v331_v53, %v219_v60 }
 0x12f   :  { %264 = vmatmul.f32.vlgmr.msrb.gmra.mxu0 %v340_v61 }
 0x130   :  { %341 = vtanh.f32 %v225_v62 }
 0x136   :  { %v342_v63 = vpop.eup %341 }
 0x137   :  { %267 = vmatmul.f32.vlgmr.msrb.gmra.mxu1 %v342_v63 }
 0x1ac   :  { %v265_v1 = vpop.f32.mrf.mxu0 }
 0x1ad   :  { %v266_v2 = vadd.f32 %v332_v0, %v265_v1 }
 0x1af   :  { %v273_v4 = vmul.f32 0.01, %v266_v2  ;;  %vm271_vm3 = vcmp.ge.f32.partialorder %v266_v2, 0.0 }
 0x1b1   :  { %v275_v5 = vsel %vm271_vm3, %v266_v2, %v273_v4 }
 0x1b2   :  { %v281_v6 = vmul.f32 %v333_v3, %v275_v5 }
 0x1b4   :  { %v268_v7 = vpop.f32.mrf.mxu1  ;;  %283 = vadd.xlane.f32.xlu0 %v281_v6 }
 0x1b5   :  { %v269_v8 = vadd.f32 %v332_v0, %v268_v7 }
 0x1b7   :  { %v274_v9 = vmul.f32 0.01, %v269_v8  ;;  %vm272_vm4 = vcmp.ge.f32.partialorder %v269_v8, 0.0 }
 0x1b9   :  { %v276_v10 = vsel %vm272_vm4, %v269_v8, %v274_v9 }
 0x1ba   :  { %v282_v11 = vmul.f32 %v333_v3, %v276_v10 }
 0x1bc   :  { %285 = vadd.xlane.f32.xlu0 %v282_v11 }
 0x227   :  { %v284_v13 = vpop.xlane.xlu0 %283 }
 0x228   :  { %v291_v14 = vadd.f32 %v334_v12, %v284_v13 }
 0x22a   :  { %294 = vst.msk [vmem:[%s524_s11] sm:$0xff] %vm293_vm5, %v291_v14 }
 0x22f   :  { %v286_v15 = vpop.xlane.xlu0 %285 }
 0x230   :  { %v292_v16 = vadd.f32 %v334_v12, %v286_v15 }
 0x232   :  { %295 = vst.msk [vmem:[%s524_s11 + $0x8] sm:$0xff] %vm293_vm5, %v292_v16 }
 0x233   :  { %300 = vsyncpa [#allocation4], 1 }
 0x234   :  { %301 = vsyncpa [#allocation6], 1 }

</bundles_post_ra>
